<compile_context>
chip_gen: v7x
topology: tpu7x:2x2x1
jax: 0.10.0
libtpu: 0.0.40
codegen_flags: <defaults>
</compile_context>

<pallas_src>
import jax
import jax.numpy as jnp
from jax import lax
from jax.experimental import pallas as pl
from jax.experimental.pallas import tpu as pltpu


def _round_up(x: int, m: int) -> int:
    return ((x + m - 1) // m) * m


def _mlp_kernel(idx_ref, t_ref, b1_ref, w2_ref, b2_ref, out_ref):
    # idx_ref: (TB, W)     int32  context-window indices for this batch tile
    # t_ref  : (W*Vp, Hp)  bf16   prefolded table, vstack_k(emb @ W1[k])
    # b1_ref : (1, Hp)     f32
    # w2_ref : (Hp, Lp)    bf16
    # b2_ref : (1, Lp)     f32
    # out_ref: (TB, Lp)    f32    lane-dense padded logits
    tb, w = idx_ref.shape
    vp = t_ref.shape[0] // w

    idx = idx_ref[...]                                          # (TB, W)
    lane_iota = lax.broadcasted_iota(jnp.int32, (tb, vp), 1)    # hoisted

    # One-hot row selection for all W window positions, stacked along lanes.
    # Vp is a multiple of 128 so the concat is lane-aligned (no shuffles);
    # 0/1 is exact in bf16, so the gather is bit-exact.
    onehot = jnp.concatenate(
        [(idx[:, k:k + 1] == lane_iota).astype(jnp.bfloat16) for k in range(w)],
        axis=1)                                                 # (TB, W*Vp)

    # Single fused gather + linear1 matmul, f32 accumulation on the MXU.
    acc = jnp.dot(onehot, t_ref[...], preferred_element_type=jnp.float32)

    # TODO(synk): on v6e/v7x a bf16 tanh doubles EUP throughput if the EUP
    # slot becomes binding; kept f32 so the same kernel is v5e-safe.
    h = jnp.tanh(acc + b1_ref[...])                             # (TB, Hp) f32

    y = jnp.dot(h.astype(jnp.bfloat16), w2_ref[...],
                preferred_element_type=jnp.float32) + b2_ref[...]
    out_ref[...] = y.astype(out_ref.dtype)


def mlp_forward(x, params, *, tile_b=1024):
    """x: (B, W=5) int indices.  Returns logits (B, num_labels) float32."""
    emb = params["embedding"]          # (V, E)
    w1_t = params["w1_t"]              # (W*E, H)  == linear1.weight.T
    b1 = params["b1"]                  # (H,)
    w2_t = params["w2_t"]              # (H, L)    == linear2.weight.T
    b2 = params["b2"]                  # (L,)

    B, W = x.shape
    V, E = emb.shape
    H = w1_t.shape[1]
    L = w2_t.shape[1]

    # --- pad vocab / hidden / label dims to the 128-lane width -------------
    Vp = _round_up(V, 128)
    Hp = _round_up(H, 128)
    Lp = _round_up(L, 128)

    # Prefold embedding into linear1: T[k] = emb @ W1[k] (f32 prefold), pad,
    # stack along the contraction axis and cast to bf16 once in the wrapper.
    # Padded vocab rows are never selected by the one-hot -> math-neutral.
    w1_3d = w1_t.reshape(W, E, H)
    folded = jnp.einsum('ve,weh->wvh', emb, w1_3d)              # (W, V, H)
    t_p = (jnp.zeros((W, Vp, Hp), jnp.float32)
           .at[:, :V, :H].set(folded)
           .reshape(W * Vp, Hp)
           .astype(jnp.bfloat16))
    b1_p = jnp.zeros((1, Hp), jnp.float32).at[0, :H].set(b1)
    w2_p = (jnp.zeros((Hp, Lp), jnp.float32).at[:H, :L].set(w2_t)
            .astype(jnp.bfloat16))
    b2_p = jnp.zeros((1, Lp), jnp.float32).at[0, :L].set(b2)

    # --- batch tiling -------------------------------------------------------
    # TB: multiple of 16 (bf16 sublane packing); capped by tile_b; chosen so
    # the grid has >= 2 steps whenever B allows it (keeps both v7x TCs busy).
    TB = _round_up(min(tile_b, max(16, -(-B // 2))), 16)
    Bp = _round_up(B, TB)
    x_p = jnp.zeros((Bp, W), jnp.int32).at[:B].set(x.astype(jnp.int32))

    cost = pl.CostEstimate(
        flops=2 * Bp * (W * Vp * Hp + Hp * Lp),
        transcendentals=Bp * Hp,
        bytes_accessed=(x_p.size * 4 + Bp * Lp * 4
                        + t_p.size * 2 + w2_p.size * 2
                        + b1_p.size * 4 + b2_p.size * 4),
    )

    # TODO(synk): for very large vocabularies the folded bf16 table no longer
    # fits VMEM (especially v7x's 64 MiB); switch to memory_space=pl.ANY +
    # PrefetchScalarGridSpec index prefetch + manual DMA row gather, and mark
    # the resident specs pipeline_mode=pl.Buffered(1).
    out = pl.pallas_call(
        _mlp_kernel,
        out_shape=jax.ShapeDtypeStruct((Bp, Lp), jnp.float32),
        grid=(Bp // TB,),
        in_specs=[
            pl.BlockSpec((TB, W), lambda i: (i, 0)),            # indices (tiled)
            pl.BlockSpec((W * Vp, Hp), lambda i: (0, 0)),       # folded table
            pl.BlockSpec((1, Hp), lambda i: (0, 0)),            # b1
            pl.BlockSpec((Hp, Lp), lambda i: (0, 0)),           # W2 (bf16)
            pl.BlockSpec((1, Lp), lambda i: (0, 0)),            # b2
        ],
        out_specs=pl.BlockSpec((TB, Lp), lambda i: (i, 0)),     # lane-dense out
        compiler_params=pltpu.CompilerParams(
            dimension_semantics=("parallel",)),
        cost_estimate=cost,
    )(x_p, t_p, b1_p, w2_p, b2_p)

    return out[:B, :L]


def init_params(key, vocab_size, embed_dim, hidden_dim, num_labels, window=5):
    """Deterministic synthetic params mirroring MLP.__init__ shapes."""
    ks = jax.random.split(key, 4)
    in_dim = embed_dim * window
    return {
        "embedding": jax.random.normal(ks[0], (vocab_size, embed_dim), jnp.float32),
        # nn.Linear(in_dim, hidden): weight (hidden, in_dim) -> stored transposed
        "w1_t": jax.random.normal(ks[1], (in_dim, hidden_dim), jnp.float32)
                / jnp.sqrt(in_dim),
        "b1": jnp.zeros((hidden_dim,), jnp.float32),
        "w2_t": jax.random.normal(ks[2], (hidden_dim, num_labels), jnp.float32)
                / jnp.sqrt(hidden_dim),
        "b2": jnp.zeros((num_labels,), jnp.float32),
    }


def _reference(x, params):
    # pure-JAX f32 reference matching the PyTorch forward
    B, W = x.shape
    e = jnp.take(params["embedding"], x, axis=0).reshape(B, -1)   # (B, W*E)
    h = jnp.tanh(e @ params["w1_t"] + params["b1"])
    return h @ params["w2_t"] + params["b2"]


if __name__ == "__main__":
    # Small synthetic sizes consistent with the module's forward.
    B, WIN = 20, 5
    VOCAB, EMBED, HIDDEN, LABELS = 50, 16, 32, 8

    key = jax.random.PRNGKey(0)
    k_param, k_idx = jax.random.split(key, 2)

    params = init_params(k_param, VOCAB, EMBED, HIDDEN, LABELS, window=WIN)
    x = jax.random.randint(k_idx, (B, WIN), 0, VOCAB, dtype=jnp.int32)

    # Default tiling gives TB=16, Bp=32 -> a 2-step parallel batch grid
    # (exercises both the grid pipeline and ragged-tail padding).
    fwd = jax.jit(lambda xx: mlp_forward(xx, params))
    out = jax.block_until_ready(fwd(x))

    ref = jax.block_until_ready(_reference(x, params))
    assert out.shape == (B, LABELS)
    # bf16 MXU operands (folded table / W2) -> loosened tolerance vs f32 ref.
    assert jnp.allclose(out, ref, atol=5e-2, rtol=5e-2), (
        float(jnp.max(jnp.abs(out - ref))))

    print("KERNEL_OK")
</pallas_src>

<mosaic_0001>
module attributes {stable_mosaic.version = 11 : i64} {
  func.func @_mlp_kernel(%arg0: i32, %arg1: memref<16x5xi32, #tpu.memory_space<vmem>>, %arg2: memref<640x128xbf16, #tpu.memory_space<vmem>>, %arg3: memref<1x128xf32, #tpu.memory_space<vmem>>, %arg4: memref<128x128xbf16, #tpu.memory_space<vmem>>, %arg5: memref<1x128xf32, #tpu.memory_space<vmem>>, %arg6: memref<16x128xf32, #tpu.memory_space<vmem>>) attributes {dimension_semantics = [#tpu.dimension_semantics<parallel>], iteration_bounds = array<i64: 2>, scalar_prefetch = 0 : i64, scratch_operands = 0 : i64, tpu.core_type = #tpu.core_type<tc>, window_params = [{transform_indices = @transform_0, window_bounds = array<i64: 16, 5>}, {pipeline_mode = #tpu.pipeline_mode<synchronous>, transform_indices = @transform_1, window_bounds = array<i64: 640, 128>}, {pipeline_mode = #tpu.pipeline_mode<synchronous>, transform_indices = @transform_2, window_bounds = array<i64: 1, 128>}, {pipeline_mode = #tpu.pipeline_mode<synchronous>, transform_indices = @transform_3, window_bounds = array<i64: 128, 128>}, {pipeline_mode = #tpu.pipeline_mode<synchronous>, transform_indices = @transform_4, window_bounds = array<i64: 1, 128>}, {transform_indices = @transform_5, window_bounds = array<i64: 16, 128>}]} {
    %c0 = arith.constant 0 : index
    %c0_0 = arith.constant 0 : index
    %0 = vector.load %arg1[%c0, %c0_0] : memref<16x5xi32, #tpu.memory_space<vmem>>, vector<16x5xi32>
    %1 = tpu.iota {dimensions = array<i32: 1>} : vector<16x128xi32>
    %2 = vector.extract_strided_slice %0 {offsets = [0, 0], sizes = [16, 1], strides = [1, 1]} : vector<16x5xi32> to vector<16x1xi32>
    %3 = vector.broadcast %2 : vector<16x1xi32> to vector<16x128xi32>
    %4 = arith.cmpi eq, %3, %1 : vector<16x128xi32>
    %5 = arith.extui %4 : vector<16x128xi1> to vector<16x128xi32>
    %6 = arith.sitofp %5 : vector<16x128xi32> to vector<16x128xf32>
    %7 = arith.truncf %6 : vector<16x128xf32> to vector<16x128xbf16>
    %8 = vector.extract_strided_slice %0 {offsets = [0, 1], sizes = [16, 1], strides = [1, 1]} : vector<16x5xi32> to vector<16x1xi32>
    %9 = vector.broadcast %8 : vector<16x1xi32> to vector<16x128xi32>
    %10 = arith.cmpi eq, %9, %1 : vector<16x128xi32>
    %11 = arith.extui %10 : vector<16x128xi1> to vector<16x128xi32>
    %12 = arith.sitofp %11 : vector<16x128xi32> to vector<16x128xf32>
    %13 = arith.truncf %12 : vector<16x128xf32> to vector<16x128xbf16>
    %14 = vector.extract_strided_slice %0 {offsets = [0, 2], sizes = [16, 1], strides = [1, 1]} : vector<16x5xi32> to vector<16x1xi32>
    %15 = vector.broadcast %14 : vector<16x1xi32> to vector<16x128xi32>
    %16 = arith.cmpi eq, %15, %1 : vector<16x128xi32>
    %17 = arith.extui %16 : vector<16x128xi1> to vector<16x128xi32>
    %18 = arith.sitofp %17 : vector<16x128xi32> to vector<16x128xf32>
    %19 = arith.truncf %18 : vector<16x128xf32> to vector<16x128xbf16>
    %20 = vector.extract_strided_slice %0 {offsets = [0, 3], sizes = [16, 1], strides = [1, 1]} : vector<16x5xi32> to vector<16x1xi32>
    %21 = vector.broadcast %20 : vector<16x1xi32> to vector<16x128xi32>
    %22 = arith.cmpi eq, %21, %1 : vector<16x128xi32>
    %23 = arith.extui %22 : vector<16x128xi1> to vector<16x128xi32>
    %24 = arith.sitofp %23 : vector<16x128xi32> to vector<16x128xf32>
    %25 = arith.truncf %24 : vector<16x128xf32> to vector<16x128xbf16>
    %26 = vector.extract_strided_slice %0 {offsets = [0, 4], sizes = [16, 1], strides = [1, 1]} : vector<16x5xi32> to vector<16x1xi32>
    %27 = vector.broadcast %26 : vector<16x1xi32> to vector<16x128xi32>
    %28 = arith.cmpi eq, %27, %1 : vector<16x128xi32>
    %29 = arith.extui %28 : vector<16x128xi1> to vector<16x128xi32>
    %30 = arith.sitofp %29 : vector<16x128xi32> to vector<16x128xf32>
    %31 = arith.truncf %30 : vector<16x128xf32> to vector<16x128xbf16>
    %32 = tpu.concatenate %7, %13, %19, %25, %31 in 1 : vector<16x128xbf16>, vector<16x128xbf16>, vector<16x128xbf16>, vector<16x128xbf16>, vector<16x128xbf16> -> vector<16x640xbf16>
    %c0_1 = arith.constant 0 : index
    %c0_2 = arith.constant 0 : index
    %33 = vector.load %arg2[%c0_1, %c0_2] : memref<640x128xbf16, #tpu.memory_space<vmem>>, vector<640x128xbf16>
    %cst = arith.constant dense<0.000000e+00> : vector<16x128xf32>
    %34 = tpu.matmul %32, %33, %cst {dimension_numbers = #tpu.dot_dimension_numbers<[1], [0], [0], [1], [0, 0, 1, 1], [], []>} : vector<16x640xbf16>, vector<640x128xbf16>, vector<16x128xf32> -> vector<16x128xf32>
    %c0_3 = arith.constant 0 : index
    %c0_4 = arith.constant 0 : index
    %35 = vector.load %arg3[%c0_3, %c0_4] : memref<1x128xf32, #tpu.memory_space<vmem>>, vector<1x128xf32>
    %36 = vector.broadcast %35 : vector<1x128xf32> to vector<16x128xf32>
    %37 = arith.addf %34, %36 : vector<16x128xf32>
    %38 = math.tanh %37 : vector<16x128xf32>
    %39 = arith.truncf %38 : vector<16x128xf32> to vector<16x128xbf16>
    %c0_5 = arith.constant 0 : index
    %c0_6 = arith.constant 0 : index
    %40 = vector.load %arg4[%c0_5, %c0_6] : memref<128x128xbf16, #tpu.memory_space<vmem>>, vector<128x128xbf16>
    %cst_7 = arith.constant dense<0.000000e+00> : vector<16x128xf32>
    %41 = tpu.matmul %39, %40, %cst_7 {dimension_numbers = #tpu.dot_dimension_numbers<[1], [0], [0], [1], [0, 0, 1, 1], [], []>} : vector<16x128xbf16>, vector<128x128xbf16>, vector<16x128xf32> -> vector<16x128xf32>
    %c0_8 = arith.constant 0 : index
    %c0_9 = arith.constant 0 : index
    %42 = vector.load %arg5[%c0_8, %c0_9] : memref<1x128xf32, #tpu.memory_space<vmem>>, vector<1x128xf32>
    %43 = vector.broadcast %42 : vector<1x128xf32> to vector<16x128xf32>
    %44 = arith.addf %41, %43 : vector<16x128xf32>
    %c0_10 = arith.constant 0 : index
    %c0_11 = arith.constant 0 : index
    %45 = vector.load %arg6[%c0_10, %c0_11] : memref<16x128xf32, #tpu.memory_space<vmem>>, vector<16x128xf32>
    tpu.vector_store %arg6[%c0_10, %c0_11], %44 {strides = array<i32>} : memref<16x128xf32, #tpu.memory_space<vmem>>, vector<16x128xf32>,
    return
  }
  func.func @transform_0(%arg0: i32) -> (i32, i32) {
    %c0_i32 = arith.constant 0 : i32
    %c0_i32_0 = arith.constant 0 : i32
    return %arg0, %c0_i32 : i32, i32
  }
  func.func @transform_1(%arg0: i32) -> (i32, i32) {
    %c0_i32 = arith.constant 0 : i32
    %c0_i32_0 = arith.constant 0 : i32
    %c0_i32_1 = arith.constant 0 : i32
    return %c0_i32, %c0_i32_0 : i32, i32
  }
  func.func @transform_2(%arg0: i32) -> (i32, i32) {
    %c0_i32 = arith.constant 0 : i32
    %c0_i32_0 = arith.constant 0 : i32
    %c0_i32_1 = arith.constant 0 : i32
    return %c0_i32, %c0_i32_0 : i32, i32
  }
  func.func @transform_3(%arg0: i32) -> (i32, i32) {
    %c0_i32 = arith.constant 0 : i32
    %c0_i32_0 = arith.constant 0 : i32
    %c0_i32_1 = arith.constant 0 : i32
    return %c0_i32, %c0_i32_0 : i32, i32
  }
  func.func @transform_4(%arg0: i32) -> (i32, i32) {
    %c0_i32 = arith.constant 0 : i32
    %c0_i32_0 = arith.constant 0 : i32
    %c0_i32_1 = arith.constant 0 : i32
    return %c0_i32, %c0_i32_0 : i32, i32
  }
  func.func @transform_5(%arg0: i32) -> (i32, i32) {
    %c0_i32 = arith.constant 0 : i32
    %c0_i32_0 = arith.constant 0 : i32
    return %arg0, %c0_i32 : i32, i32
  }
}

</mosaic_0001>

<bundles_post_ra>
// kernel: _lambda_.1
= control target key start
LH: loop header
LB: loop body
LE: loop exit
PB: predicated region body
PF: predicated region fallthrough
CT: control target
= control target key end

     0   :  { %10 = vsyncpa [#allocation3], 0  ;;  %s1303_s18 = smov 0   ;;  %s1419_s0 = inlined_call_operand.vmem [shape: s32[32,5], index: 0, kind: input, shape index: {}]   ;;  %s1420_s1 = inlined_call_operand.hbm [shape: bf16[640,128], index: 1, kind: input, shape index: {}]   ;;  %s1421_s2 = inlined_call_operand.vmem [shape: f32[1,128], index: 2, kind: input, shape index: {}]   ;;  %s1422_s3 = inlined_call_operand.vmem [shape: bf16[128,128], index: 3, kind: input, shape index: {}]   ;;  %s1423_s4 = inlined_call_operand.vmem [shape: f32[1,128], index: 4, kind: input, shape index: {}]   ;;  %s1424_s5 = inlined_call_operand.vmem [shape: f32[32,128], index: 5, kind: output, shape index: {}]  }
   0x1 LB: > { %s948_s19 = sadd.s32 4294967295, %s1260_s18   ;;  %p950_p0 = scmp.ge.s32.totalorder %s1260_s18, 1  ;;  %s1260_s18 = sphi %s1303_s18, %s16_s18  }
   0x2   : > { %p157_p1 = scmp.lt.s32.totalorder %s1260_s18, 3  ;;  %s1262_s20 = smov [#allocation2]  }
   0x3   : > { %s169_s21 = sshll.u32 %s1262_s20, 4  ;;  %p1317_p3 = scmp.eq.s32.totalorder %s948_s19, 0  ;;  %s170_s21 = int_to_ptr.vmem [resolvable:$true] %s169_s21 }
   0x4   : > { %p1311_p2 = pnand %p950_p0, %p157_p1  ;;  %s1222_s27 = scalar_lea.hbm %s1420_s1, 5120 }
   0x5   : > { %s1429_s23 = scalar_select %p1317_p3, 1, 0 }
   0x6   : > { %s1428_s22 = scalar_select %p1311_p2, 1, 0 }
   0x7   : > { %p1137_p4 = pneg %p1311_p2  ;;  %p1223_p6 = scmp.ne.s32.totalorder %s1420_s1, %s1222_s27 }
   0x8   : > { %p1229_p10 = scmp.lt.u32.totalorder %s1222_s27, %s1420_s1 }
   0x9   : > { %p1325_p5 = pnand %p1317_p3, %p1137_p4 }
   0xb   : > { %p1224_p7 = pneg %p1325_p5 }
   0xd   : > { %p1225_p8 = pnand %p1224_p7, %p1223_p6 }
   0xf   : > { %p1226_p9 = pneg %p1225_p8 }
  0x11   : > { %p1231_p11 = pnand %p1229_p10, %p1226_p9 }
  0x13   : > { %1234 = shalt.err (!%p1231_p11)
}
  0x14   : > { %s1235_s7 = scalar_lea.vmem %s170_s21, 5120  ;;  %p1243_p1 = scmp.lt.s32.totalorder %s170_s21, %s170_s21 }
  0x15   : > { %p1236_p12 = scmp.ne.s32.totalorder %s170_s21, %s1235_s7  ;;  %p1244_p4 = scmp.lt.s32.totalorder %s1235_s7, %s1235_s7 }
  0x17   : > { %p1238_p13 = pnand %p1236_p12, %p1224_p7  ;;  %p1245_p3 = por %p1244_p4, %p1243_p1 }
  0x19   : > { %p1239_p0 = pneg %p1238_p13 }
  0x1b   : > { %p1246_p2 = pnand %p1245_p3, %p1239_p0 }
  0x1d   : > { %1249 = shalt.err (!%p1246_p2)
}
  0x1e   : > { %s1263_s8 = smov 64   ;;  %s1264_s9 = smov 4  }
  0x1f   : > { %1140 = dma.hbm_to_vmem [thread:$0]  (!%p1325_p5), %s1420_s1, 5120, %s170_s21, [#allocation3], %s1263_s8, %s1263_s8, %s1264_s9  }
  0x20   : > { %p1431_p6 = scmp.ne.s32.totalorder %s1428_s22, 0 }
  0x21   : > { %p1432_p8 = scmp.ne.s32.totalorder (!%p1431_p6), %s1429_s23, 0 }
  0x22   : > { %203 = sbr.rel (%p1431_p6) target bundleno = 663 (0x297), region = 40 }
  0x29   : > { %1255 = dma.done.wait (%p1432_p8), [#allocation3], 5120  }
  0x2a   : > { %1257 = vsyncadd (%p1432_p8), [#allocation3], 4294962176  ;;  %s955_s12 = sshll.u32 %s948_s19, 1  ;;  %v1265_v0 = vmov 1   ;;  %v1266_v1 = vmov 0   ;;  %v1170_v4 = vld [vmem:[#allocation2 + $0x40] sm:$0xff]   ;;  %v246_v40 = vlaneseq }
  0x2b   : > { %1162 = vset.pattern.permute.xlu0 %v1265_v0  ;;  %1163 = vset.pattern.permute.xlu1 %v1266_v1  ;;  %p232_p2 = scmp.lt.s32.totalorder %s955_s12, 3  ;;  %v1171_v5 = vld [vmem:[#allocation2] sm:$0xff]   ;;  %v1172_v6 = vld [vmem:[#allocation2 + $0x48] sm:$0xff]   ;;  %v1174_v8 = vld [vmem:[#allocation2 + $0x50] sm:$0xff]   ;;  %v1267_v12 = vmov 3   ;;  %v1268_v18 = vmov 2  }
  0x2c   : > { %1031 = vmatprep.subr.bf16.mxu0 %v1170_v4  ;;  %v1173_v7 = vld [vmem:[#allocation2 + $0x8] sm:$0xff]   ;;  %v1175_v9 = vld [vmem:[#allocation2 + $0x10] sm:$0xff]   ;;  %v1176_v10 = vld [vmem:[#allocation2 + $0xc0] sm:$0xff]   ;;  %v1269_v24 = vmov 4   ;;  %v1270_v36 = vmov 0.0   ;;  %v247_v43 = vand.u32 127, %v246_v40 }
  0x2d   : > { %s1434_s12 = smov (!%p232_p2, %s955_s12), 3  ;;  %1032 = vmatpush3.bf16.msra.mxu0 %v1171_v5  ;;  %v1177_v11 = vld [vmem:[#allocation2 + $0x80] sm:$0xff]   ;;  %v1178_v13 = vld [vmem:[#allocation2 + $0x58] sm:$0xff]   ;;  %1053 = vmatprep.subr.bf16.mxu1 %v1176_v10  ;;  %v1180_v15 = vld [vmem:[#allocation2 + $0xc8] sm:$0xff]   ;;  %v1271_v47 = vmov 1.0|1.0  }
  0x2e   : > { %s956_s13 = sshll.u32 %s1434_s12, 3  ;;  %1033 = vmatprep.subr.bf16.mxu0 %v1172_v6  ;;  %v1179_v14 = vld [vmem:[#allocation2 + $0x18] sm:$0xff]   ;;  %1054 = vmatpush3.bf16.msra.mxu1 %v1177_v11  ;;  %v1181_v16 = vld [vmem:[#allocation2 + $0x88] sm:$0xff]   ;;  %v1182_v17 = vld [vmem:[#allocation2 + $0x60] sm:$0xff]   ;;  %vm1272_vm8 = vmmov 0  }
  0x2f   : > { %s235_s16 = scalar_lea.vmem %s1419_s0, %s956_s13  ;;  %1055 = vmatprep.subr.bf16.mxu1 %v1180_v15  ;;  %v1183_v19 = vld [vmem:[#allocation2 + $0x20] sm:$0xff]   ;;  %v1184_v20 = vld [vmem:[#allocation2 + $0xd0] sm:$0xff]   ;;  %v1186_v22 = vld [vmem:[#allocation2 + $0x68] sm:$0xff]   ;;  %s241_s17 = scalar_lea.vmem %s1424_s5, %s956_s13 }
  0x30   : > { %v244_v2 = vld [vmem:[%s235_s16] sm:$0xff]  ;;  %v245_v3 = vld [vmem:[%s235_s16 + $0x8] sm:$0xff]  ;;  %v1185_v21 = vld [vmem:[#allocation2 + $0x90] sm:$0xff]  }
  0x31   : > { %249 = vperm.xlu1 %1163, %v244_v2   ;;  %262 = vperm.xlu0 %1162, %v244_v2   ;;  %v1187_v23 = vld [vmem:[#allocation2 + $0x28] sm:$0xff]   ;;  %v1188_v25 = vld [vmem:[#allocation2 + $0xd8] sm:$0xff]   ;;  %v1190_v27 = vld [vmem:[#allocation2 + $0x70] sm:$0xff]  }
  0x32   : > { %1034 = vmatpush3.bf16.msra.mxu0 %v1173_v7  ;;  %1056 = vmatpush3.bf16.msra.mxu1 %v1181_v16  ;;  %v1189_v26 = vld [vmem:[#allocation2 + $0x98] sm:$0xff]   ;;  %v1191_v28 = vld [vmem:[#allocation2 + $0x30] sm:$0xff]   ;;  %v1192_v29 = vld [vmem:[#allocation2 + $0xe0] sm:$0xff]  }
  0x33   : > { %1035 = vmatprep.subr.bf16.mxu0 %v1174_v8  ;;  %1057 = vmatprep.subr.bf16.mxu1 %v1184_v20  ;;  %v1193_v30 = vld [vmem:[#allocation2 + $0xa0] sm:$0xff]   ;;  %v1194_v31 = vld [vmem:[#allocation2 + $0x78] sm:$0xff]   ;;  %v1196_v32 = vld [vmem:[#allocation2 + $0xe8] sm:$0xff]  }
  0x34   : > { %v1195_v33 = vld [vmem:[#allocation2 + $0x38] sm:$0xff]   ;;  %v1197_v34 = vld [vmem:[#allocation2 + $0xa8] sm:$0xff]   ;;  %v1199_v35 = vld [vmem:[#allocation2 + $0xf0] sm:$0xff]  }
  0x35   : > { %252 = vperm.xlu1 %1163, %v245_v3   ;;  %265 = vperm.xlu0 %1162, %v245_v3   ;;  %v1200_v37 = vld [vmem:[#allocation2 + $0xb0] sm:$0xff]   ;;  %v1202_v38 = vld [vmem:[#allocation2 + $0xf8] sm:$0xff]   ;;  %v1198_v46 = vld [vmem:[#allocation2 + $0x100] sm:$0xff]  }
  0x36   : > { %1036 = vmatpush3.bf16.msra.mxu0 %v1175_v9  ;;  %1058 = vmatpush3.bf16.msra.mxu1 %v1185_v21  ;;  %v1203_v39 = vld [vmem:[#allocation2 + $0xb8] sm:$0xff]   ;;  %v1201_v50 = vld [vmem:[#allocation2 + $0x108] sm:$0xff]   ;;  %v1204_v53 = vld [vmem:[#allocation2 + $0x110] sm:$0xff]  }
  0x37   : > { %1037 = vmatprep.subr.bf16.mxu0 %v1178_v13  ;;  %1059 = vmatprep.subr.bf16.mxu1 %v1188_v25  ;;  %v1205_v54 = vld [vmem:[#allocation2 + $0x118] sm:$0xff]   ;;  %v1206_v55 = vld [vmem:[#allocation2 + $0x120] sm:$0xff]   ;;  %v1207_v56 = vld [vmem:[#allocation2 + $0x128] sm:$0xff]  }
  0x38   : > { %v1208_v58 = vld [vmem:[#allocation2 + $0x130] sm:$0xff]   ;;  %v1209_v60 = vld [vmem:[#allocation2 + $0x138] sm:$0xff]   ;;  %v1210_v61 = vld [vmem:[%s1422_s3] sm:$0xff]  }
  0x39   : > { %1165 = vset.pattern.permute.xlu1 %v1267_v12  ;;  %1164 = vset.pattern.permute.xlu0 %v1267_v12  ;;  %v1211_v62 = vld [vmem:[%s1422_s3 + $0x8] sm:$0xff]   ;;  %v1212_v63 = vld [vmem:[%s1422_s3 + $0x10] sm:$0xff]   ;;  %v1213_v0 = vld [vmem:[%s1422_s3 + $0x18] sm:$0xff]  }
  0x3a   : > { %291 = vperm.xlu1 %1165, %v245_v3   ;;  %288 = vperm.xlu0 %1164, %v244_v2   ;;  %v1214_v1 = vld [vmem:[%s1422_s3 + $0x20] sm:$0xff]   ;;  %v1217_v4 = vld [vmem:[%s1422_s3 + $0x38] sm:$0xff]  }
  0x3b   : > { %1038 = vmatpush3.bf16.msra.mxu0 %v1179_v14  ;;  %1060 = vmatpush3.bf16.msra.mxu1 %v1189_v26  ;;  %v969_v11 = vld [vmem:[%s1421_s2] ss:$0 sm:$0xff] }
  0x3c   : > { %1039 = vmatprep.subr.bf16.mxu0 %v1182_v17  ;;  %1061 = vmatprep.subr.bf16.mxu1 %v1192_v29 }
  0x3e   : > { %1166 = vset.pattern.permute.xlu1 %v1268_v18  ;;  %1167 = vset.pattern.permute.xlu0 %v1268_v18 }
  0x3f   : > { %275 = vperm.xlu1 %1166, %v244_v2   ;;  %278 = vperm.xlu0 %1167, %v245_v3  }
  0x40   : > { %1040 = vmatpush3.bf16.msra.mxu0 %v1183_v19  ;;  %1062 = vmatpush3.bf16.msra.mxu1 %v1193_v30 }
  0x41   : > { %1041 = vmatprep.subr.bf16.mxu0 %v1186_v22  ;;  %1063 = vmatprep.subr.bf16.mxu1 %v1196_v32 }
  0x43   : > { %1168 = vset.pattern.permute.xlu1 %v1269_v24  ;;  %1169 = vset.pattern.permute.xlu0 %v1269_v24 }
  0x44   : > { %301 = vperm.xlu1 %1168, %v244_v2   ;;  %1042 = vmatpush3.bf16.msra.mxu0 %v1187_v23  ;;  %v1215_v2 = vld [vmem:[%s1422_s3 + $0x28] sm:$0xff]  }
  0x45   : > { %1043 = vmatprep.subr.bf16.mxu0 %v1190_v27  ;;  %1064 = vmatpush3.bf16.msra.mxu1 %v1197_v34 }
  0x46   : > { %1065 = vmatprep.subr.bf16.mxu1 %v1199_v35 }
  0x48   : > { %304 = vperm.xlu1 %1168, %v245_v3   ;;  %1044 = vmatpush3.bf16.msra.mxu0 %v1191_v28  ;;  %v1216_v3 = vld [vmem:[%s1422_s3 + $0x30] sm:$0xff]  }
  0x49   : > { %1045 = vmatprep.subr.bf16.mxu0 %v1194_v31  ;;  %1066 = vmatpush3.bf16.msra.mxu1 %v1200_v37  ;;  %v1020_v31 = vld [vmem:[%s1423_s4] ss:$0 sm:$0xff] }
  0x4a   : > { %1067 = vmatprep.subr.bf16.mxu1 %v1202_v38 }
  0x4c   : > { %1046 = vmatpush3.bf16.msra.mxu0 %v1195_v33 }
  0x4d   : > { %1093 = vmatprep.subr.bf16.mxu0 %v1270_v36  ;;  %1068 = vmatpush3.bf16.msra.mxu1 %v1203_v39 }
  0x4e   : > { %1113 = vmatprep.subr.bf16.mxu1 %v1270_v36 }
  0xb0   : > { %v250_v41 = vpop.permute.xlu1 %249  ;;  %v263_v42 = vpop.permute.xlu0 %262 }
  0xb1   : > { %vm254_vm0 = vcmp.eq.s32.totalorder %v250_v41, %v247_v43  ;;  %vm267_vm3 = vcmp.eq.s32.totalorder %v263_v42, %v247_v43 }
  0xb4   : > { %v253_v44 = vpop.permute.xlu1 %252  ;;  %v266_v45 = vpop.permute.xlu0 %265 }
  0xb5   : > { %vm255_vm1 = vcmp.eq.s32.totalorder %v253_v44, %v247_v43  ;;  %vm268_vm2 = vcmp.eq.s32.totalorder %v266_v45, %v247_v43 }
  0xb6   : > { %vm1012_vm4 = vmpackc.low %vm255_vm1, %vm254_vm0 }
  0xb7   : > { %vm1010_vm5 = vmpackc.low %vm268_vm2, %vm267_vm3 }
  0xb8   : > { %1011 = vmatprep.mubr.msk.bf16.mxu0 %vm1010_vm5, %v1271_v47 }
  0xb9   : > { %1013 = vmatmul.mubr.msk.bf16.vlgmr.msra.gmra.mrb[0].mxu0 %vm1012_vm4, %v1271_v47  ;;  %v292_v48 = vpop.permute.xlu1 %291  ;;  %v289_v49 = vpop.permute.xlu0 %288 }
  0xba   : > { %1094 = vmatpush3.bf16.msra.mxu0 %v1198_v46  ;;  %vm294_vm6 = vcmp.eq.s32.totalorder %v292_v48, %v247_v43  ;;  %vm293_vm7 = vcmp.eq.s32.totalorder %v289_v49, %v247_v43  ;;  %1109 = vmatprep.mubr.msk.bf16.mxu0 %vm1272_vm8, %v1270_v36 }
  0xbb   : > { %1095 = vmatprep.subr.bf16.mxu0 %v1270_v36  ;;  %vm1014_vm9 = vmpackc.low %vm294_vm6, %vm293_vm7 }
  0xbc   : > { %1015 = vmatprep.mubr.msk.bf16.mxu1 %vm1014_vm9, %v1271_v47 }
  0xbe   : > { %1096 = vmatpush3.bf16.msra.mxu0 %v1201_v50  ;;  %v276_v51 = vpop.permute.xlu1 %275  ;;  %v279_v52 = vpop.permute.xlu0 %278 }
  0xbf   : > { %vm280_vm10 = vcmp.eq.s32.totalorder %v276_v51, %v247_v43  ;;  %vm281_vm11 = vcmp.eq.s32.totalorder %v279_v52, %v247_v43  ;;  %1097 = vmatprep.subr.bf16.mxu0 %v1270_v36 }
  0xc0   : > { %vm1016_vm12 = vmpackc.low %vm281_vm11, %vm280_vm10 }
  0xc1   : > { %1017 = vmatmul.mubr.msk.bf16.vlgmr.msra.gmra.mrb[0].mxu1 %vm1016_vm12, %v1271_v47 }
  0xc2   : > { %1098 = vmatpush3.bf16.msra.mxu0 %v1204_v53  ;;  %1129 = vmatprep.mubr.msk.bf16.mxu1 %vm1272_vm8, %v1270_v36 }
  0xc3   : > { %1099 = vmatprep.subr.bf16.mxu0 %v1270_v36  ;;  %v302_v57 = vpop.permute.xlu1 %301  ;;  %1114 = vmatpush3.bf16.msra.mxu1 %v1210_v61 }
  0xc4   : > { %vm306_vm13 = vcmp.eq.s32.totalorder %v302_v57, %v247_v43  ;;  %1115 = vmatprep.subr.bf16.mxu1 %v1270_v36 }
  0xc6   : > { %1100 = vmatpush3.bf16.msra.mxu0 %v1205_v54 }
  0xc7   : > { %1101 = vmatprep.subr.bf16.mxu0 %v1270_v36  ;;  %v305_v59 = vpop.permute.xlu1 %304  ;;  %1116 = vmatpush3.bf16.msra.mxu1 %v1211_v62 }
  0xc8   : > { %vm307_vm14 = vcmp.eq.s32.totalorder %v305_v59, %v247_v43  ;;  %1117 = vmatprep.subr.bf16.mxu1 %v1270_v36 }
  0xc9   : > { %vm1018_vm15 = vmpackc.low %vm307_vm14, %vm306_vm13 }
  0xca   : > { %1102 = vmatpush3.bf16.msra.mxu0 %v1206_v55 }
  0xcb   : > { %1103 = vmatprep.subr.bf16.mxu0 %v1270_v36  ;;  %1118 = vmatpush3.bf16.msra.mxu1 %v1212_v63 }
  0xcc   : > { %1119 = vmatprep.subr.bf16.mxu1 %v1270_v36 }
  0xce   : > { %1104 = vmatpush3.bf16.msra.mxu0 %v1207_v56 }
  0xcf   : > { %1105 = vmatprep.subr.bf16.mxu0 %v1270_v36  ;;  %1120 = vmatpush3.bf16.msra.mxu1 %v1213_v0 }
  0xd0   : > { %1121 = vmatprep.subr.bf16.mxu1 %v1270_v36 }
  0xd2   : > { %1106 = vmatpush3.bf16.msra.mxu0 %v1208_v58 }
  0xd3   : > { %1107 = vmatprep.subr.bf16.mxu0 %v1270_v36  ;;  %1122 = vmatpush3.bf16.msra.mxu1 %v1214_v1 }
  0xd4   : > { %1123 = vmatprep.subr.bf16.mxu1 %v1270_v36 }
  0xd6   : > { %1108 = vmatpush3.bf16.msra.mxu0 %v1209_v60 }
  0xd7   : > { %1124 = vmatpush3.bf16.msra.mxu1 %v1215_v2 }
  0xd8   : > { %1125 = vmatprep.subr.bf16.mxu1 %v1270_v36 }
  0xd9   : > { %1110 = vmatmul.mubr.msk.bf16.vlgmr.msra.gmra.mrb[4].mxu0 %vm1018_vm15, %v1271_v47 }
  0xdb   : > { %1126 = vmatpush3.bf16.msra.mxu1 %v1216_v3 }
  0xdc   : > { %1127 = vmatprep.subr.bf16.mxu1 %v1270_v36 }
  0xdf   : > { %1128 = vmatpush3.bf16.msra.mxu1 %v1217_v4 }
 0x18c   : > { %v1047_v5 = vpop.f32.mrb[0].mxu0 }
 0x18d   : > { %v1048_v6 = vpop.f32.mrb[1].mxu0 }
 0x18e   : > { %v1049_v7 = vadd.f32 %v1048_v6, %v1047_v5  ;;  %v1050_v8 = vpop.f32.mrb[2].mxu0 }
 0x18f   : > { %v1051_v9 = vpop.f32.mrb[3].mxu0 }
 0x190   : > { %v1052_v10 = vadd.f32 %v1051_v9, %v1050_v8  ;;  %v675_v14 = vadd.f32 %v1049_v7, %v969_v11 }
 0x192   : > { %v678_v18 = vadd.f32 %v1052_v10, %v969_v11 }
 0x194   : > { %v1069_v12 = vpop.f32.mrb[0].mxu1 }
 0x195   : > { %v1070_v13 = vpop.f32.mrb[1].mxu1 }
 0x196   : > { %v1071_v15 = vadd.f32 %v1070_v13, %v1069_v12  ;;  %v1072_v16 = vpop.f32.mrb[2].mxu1 }
 0x197   : > { %v1073_v17 = vpop.f32.mrb[3].mxu1 }
 0x198   : > { %v1074_v19 = vadd.f32 %v1073_v17, %v1072_v16  ;;  %v716_v20 = vadd.f32 %v1071_v15, %v675_v14 }
 0x19a   : > { %v719_v21 = vadd.f32 %v1074_v19, %v678_v18 }
 0x1ac   : > { %v756_v22 = vpop.f32.mrb[4].mxu0 }
 0x1ad   : > { %v757_v23 = vadd.f32 %v756_v22, %v716_v20  ;;  %v1111_v24 = vpop.f32.mrb[5].mxu0 }
 0x1ae   : > { %v759_v25 = vpop.f32.mrb[6].mxu0 }
 0x1af   : > { %v760_v26 = vadd.f32 %v759_v25, %v719_v21  ;;  %v1112_v27 = vpop.f32.mrb[7].mxu0  ;;  %1218 = vtanh.f32 %v757_v23 }
 0x1b1   : > { %1220 = vtanh.f32 %v760_v26 }
 0x1b9   : > { %v1219_v28 = vpop.eup %1218 }
 0x1bb   : > { %v1221_v29 = vpop.eup %1220 }
 0x1bc   : > { %v765_v30 = vpack.c.bf16 %v1221_v29, %v1219_v28 }
 0x1be   : > { %1130 = vmatmul.mubr.bf16.vlgmr.msra.gmra.mrb[4].mxu1 %v765_v30 }
 0x291   : > { %v871_v32 = vpop.f32.mrb[4].mxu1 }
 0x292   : > { %v872_v33 = vadd.f32 %v1020_v31, %v871_v32  ;;  %v1131_v34 = vpop.f32.mrb[5].mxu1 }
 0x293   : > { %v874_v35 = vpop.f32.mrb[6].mxu1 }
 0x294   : > { %878 = vst [vmem:[%s241_s17] sm:$0xff] %v872_v33  ;;  %v875_v36 = vadd.f32 %v1020_v31, %v874_v35  ;;  %v1132_v37 = vpop.f32.mrb[7].mxu1 }
 0x296   : > { %879 = vst [vmem:[%s241_s17 + $0x8] sm:$0xff] %v875_v36 }
 0x297 PF: > { %s16_s18 = sadd.s32 1, %s1260_s18  }
 0x298   : > { %p13_p3 = scmp.ge.s32.totalorder %s16_s18, 4  }
 0x29a   :  { %15 = sbr.rel (!%p13_p3) target bundleno = 1 (0x1), region = 75 }
 0x2a1   :  { %902 = vsyncpa [#allocation3], 1 }
 0x2a2   :  { %904 = vsyncpa [#allocation3 + $0x1], 1 }

</bundles_post_ra>
